<compile_context>
chip_gen: v7x
topology: tpu7x:2x2x1
jax: 0.10.0
libtpu: 0.0.40
codegen_flags: <defaults>
</compile_context>

<pallas_src>
import functools

import jax
import jax.numpy as jnp
from jax.experimental import pallas as pl
from jax.experimental.pallas import tpu as pltpu

INPUT_SIZE = 720
PADDED_INPUT = 768          # 720 rounded up to a multiple of 128 (slab alignment)
HIDDEN_SIZE = 256
OUTPUT_SIZE = 4


def _round_up(n, m):
    return (n + m - 1) // m * m


def _choose_tb(batch, tb_max):
    """Pick the batch tile from a target grid-step count.

    - batch < 256: single small step (padding to 8 rows only).
    - batch >= 256: at least 2 steps so v7x's second TensorCore gets work
      (grid axis is "parallel"); TB = ceil(batch/steps) rounded to 8 so the
      trailing tile is never near-empty, capped by tb_max.
    """
    b8 = _round_up(max(batch, 1), 8)
    if b8 < 256:
        return b8
    steps = max(2, pl.cdiv(b8, tb_max))
    return _round_up(pl.cdiv(b8, steps), 8)


def robot_nn_kernel(x_ref, w123_ref, w4_ref, b_ref, o_ref):
    # x arrives as f32; cast to bf16 on the VPU (hidden under the x DMA).
    x = x_ref[...].astype(jnp.bfloat16)                         # (TB, 720)

    # fc1 + ReLU   (dropout1 == identity in eval)
    w1 = w123_ref[0:INPUT_SIZE, :]                              # (720, 256) bf16
    h = jnp.dot(x, w1, preferred_element_type=jnp.float32)
    h = jnp.maximum(h + b_ref[0], 0.0)

    # fc2 + ReLU   (dropout2 == identity in eval)
    w2 = w123_ref[PADDED_INPUT:PADDED_INPUT + HIDDEN_SIZE, :]
    h = jnp.dot(h.astype(jnp.bfloat16), w2,
                preferred_element_type=jnp.float32)
    h = jnp.maximum(h + b_ref[1], 0.0)

    # fc3 + ReLU   (dropout3 == identity in eval)
    w3 = w123_ref[PADDED_INPUT + HIDDEN_SIZE:PADDED_INPUT + 2 * HIDDEN_SIZE, :]
    h = jnp.dot(h.astype(jnp.bfloat16), w3,
                preferred_element_type=jnp.float32)
    h = jnp.maximum(h + b_ref[2], 0.0)

    # fc4 (no activation)
    out = jnp.dot(h.astype(jnp.bfloat16), w4_ref[...],
                  preferred_element_type=jnp.float32)
    b4 = b_ref[3][:, 0:OUTPUT_SIZE]                             # (1, 4) f32
    o_ref[...] = (out + b4).astype(o_ref.dtype)


def pack_params(params):
    """bf16 weight slab [1280, 256] (w1 zero-padded to 768 rows) + bias stack."""
    bf = jnp.bfloat16
    w1 = jnp.pad(params["w1"].astype(bf),
                 ((0, PADDED_INPUT - INPUT_SIZE), (0, 0)))       # [768, 256]
    w123 = jnp.concatenate(
        [w1, params["w2"].astype(bf), params["w3"].astype(bf)],
        axis=0)                                                  # [1280, 256] bf16
    w4 = params["w4"].astype(bf)                                 # [256, 4]   bf16
    b4p = jnp.pad(params["b4"],
                  ((0, 0), (0, HIDDEN_SIZE - OUTPUT_SIZE)))      # [1, 256]
    biases = jnp.stack([params["b1"], params["b2"], params["b3"], b4p],
                       axis=0)                                   # [4, 1, 256] f32
    return w123, w4, biases


@functools.partial(jax.jit, static_argnames=("tb_max",))
def robot_nn_forward(x, params, *, tb_max=1024):
    """x: [B, INPUT_SIZE] float32; params: dict of f32 weights/biases."""
    B = x.shape[0]
    TB = _choose_tb(B, tb_max)
    Bp = _round_up(B, TB)

    w123, w4, biases = pack_params(params)

    xp = x if Bp == B else jnp.pad(x, ((0, Bp - B), (0, 0)))     # keep f32

    def const_spec(arr):
        zeros = (0,) * arr.ndim
        # Same block for every batch tile -> DMA'd once, VMEM-resident.
        return pl.BlockSpec(arr.shape, lambda i, _z=zeros: _z)

    out = pl.pallas_call(
        robot_nn_kernel,
        out_shape=jax.ShapeDtypeStruct((Bp, OUTPUT_SIZE), jnp.float32),
        grid=(Bp // TB,),
        in_specs=[
            pl.BlockSpec((TB, INPUT_SIZE), lambda i: (i, 0)),    # f32 x, full K
            const_spec(w123),
            const_spec(w4),
            const_spec(biases),
        ],
        out_specs=pl.BlockSpec((TB, OUTPUT_SIZE), lambda i: (i, 0)),
        compiler_params=pltpu.CompilerParams(
            dimension_semantics=("parallel",),
            vmem_limit_bytes=32 << 20,
        ),
    )(xp, w123, w4, biases)
    return out[:B]


def init_params(key):
    """Deterministic init matching nn.Linear shapes (stored as [in, out], f32)."""
    ks = jax.random.split(key, 8)

    def linear(kw, kb, fan_in, fan_out):
        bound = 1.0 / jnp.sqrt(jnp.float32(fan_in))
        w = jax.random.uniform(kw, (fan_in, fan_out), jnp.float32, -bound, bound)
        b = jax.random.uniform(kb, (1, fan_out), jnp.float32, -bound, bound)
        return w, b

    w1, b1 = linear(ks[0], ks[1], INPUT_SIZE, HIDDEN_SIZE)
    w2, b2 = linear(ks[2], ks[3], HIDDEN_SIZE, HIDDEN_SIZE)
    w3, b3 = linear(ks[4], ks[5], HIDDEN_SIZE, HIDDEN_SIZE)
    w4, b4 = linear(ks[6], ks[7], HIDDEN_SIZE, OUTPUT_SIZE)
    return dict(w1=w1, b1=b1, w2=w2, b2=b2, w3=w3, b3=b3, w4=w4, b4=b4)


def reference_forward(x, p):
    """Pure-JAX reference using the same bf16 weight/activation quantization."""
    bf = jnp.bfloat16

    def dense(h, w, b, relu=True):
        y = jnp.dot(h.astype(bf), w.astype(bf),
                    preferred_element_type=jnp.float32) + b
        return jnp.maximum(y, 0.0) if relu else y

    h = dense(x, p["w1"], p["b1"])
    h = dense(h, p["w2"], p["b2"])
    h = dense(h, p["w3"], p["b3"])
    return dense(h, p["w4"], p["b4"], relu=False)


if __name__ == "__main__":
    key = jax.random.PRNGKey(0)
    k_x, k_p = jax.random.split(key)

    batch = 8
    x = jax.random.normal(k_x, (batch, INPUT_SIZE), jnp.float32)
    params = init_params(k_p)

    out = jax.block_until_ready(robot_nn_forward(x, params))
    ref = reference_forward(x, params)

    assert out.shape == (batch, OUTPUT_SIZE)
    assert jnp.allclose(out, ref, atol=2e-2, rtol=2e-2), (
        f"max abs err {jnp.max(jnp.abs(out - ref))}")

    print("KERNEL_OK")
</pallas_src>

<mosaic_0001>
module attributes {stable_mosaic.version = 11 : i64} {
  func.func @robot_nn_kernel(%arg0: i32, %arg1: memref<8x720xf32, #tpu.memory_space<vmem>>, %arg2: memref<1280x256xbf16, #tpu.memory_space<vmem>>, %arg3: memref<256x4xbf16, #tpu.memory_space<vmem>>, %arg4: memref<4x1x256xf32, #tpu.memory_space<vmem>>, %arg5: memref<8x4xf32, #tpu.memory_space<vmem>>) attributes {dimension_semantics = [#tpu.dimension_semantics<parallel>], iteration_bounds = array<i64: 1>, scalar_prefetch = 0 : i64, scratch_operands = 0 : i64, tpu.core_type = #tpu.core_type<tc>, window_params = [{transform_indices = @transform_0, window_bounds = array<i64: 8, 720>}, {pipeline_mode = #tpu.pipeline_mode<synchronous>, transform_indices = @transform_1, window_bounds = array<i64: 1280, 256>}, {pipeline_mode = #tpu.pipeline_mode<synchronous>, transform_indices = @transform_2, window_bounds = array<i64: 256, 4>}, {pipeline_mode = #tpu.pipeline_mode<synchronous>, transform_indices = @transform_3, window_bounds = array<i64: 4, 1, 256>}, {transform_indices = @transform_4, window_bounds = array<i64: 8, 4>}]} {
    %c0 = arith.constant 0 : index
    %c0_0 = arith.constant 0 : index
    %0 = vector.load %arg1[%c0, %c0_0] : memref<8x720xf32, #tpu.memory_space<vmem>>, vector<8x720xf32>
    %1 = arith.truncf %0 : vector<8x720xf32> to vector<8x720xbf16>
    %c0_1 = arith.constant 0 : index
    %c0_2 = arith.constant 0 : index
    %2 = vector.load %arg2[%c0_1, %c0_2] : memref<1280x256xbf16, #tpu.memory_space<vmem>>, vector<720x256xbf16>
    %cst = arith.constant dense<0.000000e+00> : vector<8x256xf32>
    %3 = tpu.matmul %1, %2, %cst {dimension_numbers = #tpu.dot_dimension_numbers<[1], [0], [0], [1], [0, 0, 1, 1], [], []>} : vector<8x720xbf16>, vector<720x256xbf16>, vector<8x256xf32> -> vector<8x256xf32>
    %c0_3 = arith.constant 0 : index
    %c0_4 = arith.constant 0 : index
    %c0_5 = arith.constant 0 : index
    %4 = vector.load %arg4[%c0_3, %c0_4, %c0_5] : memref<4x1x256xf32, #tpu.memory_space<vmem>>, vector<1x1x256xf32>
    %5 = vector.shape_cast %4 : vector<1x1x256xf32> to vector<1x256xf32>
    %6 = vector.broadcast %5 : vector<1x256xf32> to vector<8x256xf32>
    %7 = arith.addf %3, %6 : vector<8x256xf32>
    %cst_6 = arith.constant 0.000000e+00 : f32
    %8 = vector.broadcast %cst_6 : f32 to vector<8x256xf32>
    %9 = arith.maximumf %7, %8 : vector<8x256xf32>
    %c768 = arith.constant 768 : index
    %c0_7 = arith.constant 0 : index
    %10 = vector.load %arg2[%c768, %c0_7] : memref<1280x256xbf16, #tpu.memory_space<vmem>>, vector<256x256xbf16>
    %11 = arith.truncf %9 : vector<8x256xf32> to vector<8x256xbf16>
    %cst_8 = arith.constant dense<0.000000e+00> : vector<8x256xf32>
    %12 = tpu.matmul %11, %10, %cst_8 {dimension_numbers = #tpu.dot_dimension_numbers<[1], [0], [0], [1], [0, 0, 1, 1], [], []>} : vector<8x256xbf16>, vector<256x256xbf16>, vector<8x256xf32> -> vector<8x256xf32>
    %c1 = arith.constant 1 : index
    %c0_9 = arith.constant 0 : index
    %c0_10 = arith.constant 0 : index
    %13 = vector.load %arg4[%c1, %c0_9, %c0_10] : memref<4x1x256xf32, #tpu.memory_space<vmem>>, vector<1x1x256xf32>
    %14 = vector.shape_cast %13 : vector<1x1x256xf32> to vector<1x256xf32>
    %15 = vector.broadcast %14 : vector<1x256xf32> to vector<8x256xf32>
    %16 = arith.addf %12, %15 : vector<8x256xf32>
    %cst_11 = arith.constant 0.000000e+00 : f32
    %17 = vector.broadcast %cst_11 : f32 to vector<8x256xf32>
    %18 = arith.maximumf %16, %17 : vector<8x256xf32>
    %c1024 = arith.constant 1024 : index
    %c0_12 = arith.constant 0 : index
    %19 = vector.load %arg2[%c1024, %c0_12] : memref<1280x256xbf16, #tpu.memory_space<vmem>>, vector<256x256xbf16>
    %20 = arith.truncf %18 : vector<8x256xf32> to vector<8x256xbf16>
    %cst_13 = arith.constant dense<0.000000e+00> : vector<8x256xf32>
    %21 = tpu.matmul %20, %19, %cst_13 {dimension_numbers = #tpu.dot_dimension_numbers<[1], [0], [0], [1], [0, 0, 1, 1], [], []>} : vector<8x256xbf16>, vector<256x256xbf16>, vector<8x256xf32> -> vector<8x256xf32>
    %c2 = arith.constant 2 : index
    %c0_14 = arith.constant 0 : index
    %c0_15 = arith.constant 0 : index
    %22 = vector.load %arg4[%c2, %c0_14, %c0_15] : memref<4x1x256xf32, #tpu.memory_space<vmem>>, vector<1x1x256xf32>
    %23 = vector.shape_cast %22 : vector<1x1x256xf32> to vector<1x256xf32>
    %24 = vector.broadcast %23 : vector<1x256xf32> to vector<8x256xf32>
    %25 = arith.addf %21, %24 : vector<8x256xf32>
    %cst_16 = arith.constant 0.000000e+00 : f32
    %26 = vector.broadcast %cst_16 : f32 to vector<8x256xf32>
    %27 = arith.maximumf %25, %26 : vector<8x256xf32>
    %28 = arith.truncf %27 : vector<8x256xf32> to vector<8x256xbf16>
    %c0_17 = arith.constant 0 : index
    %c0_18 = arith.constant 0 : index
    %29 = vector.load %arg3[%c0_17, %c0_18] : memref<256x4xbf16, #tpu.memory_space<vmem>>, vector<256x4xbf16>
    %cst_19 = arith.constant dense<0.000000e+00> : vector<8x4xf32>
    %30 = tpu.matmul %28, %29, %cst_19 {dimension_numbers = #tpu.dot_dimension_numbers<[1], [0], [0], [1], [0, 0, 1, 1], [], []>} : vector<8x256xbf16>, vector<256x4xbf16>, vector<8x4xf32> -> vector<8x4xf32>
    %c3 = arith.constant 3 : index
    %c0_20 = arith.constant 0 : index
    %c0_21 = arith.constant 0 : index
    %31 = vector.load %arg4[%c3, %c0_20, %c0_21] : memref<4x1x256xf32, #tpu.memory_space<vmem>>, vector<1x1x256xf32>
    %32 = vector.shape_cast %31 : vector<1x1x256xf32> to vector<1x256xf32>
    %33 = vector.extract_strided_slice %32 {offsets = [0, 0], sizes = [1, 4], strides = [1, 1]} : vector<1x256xf32> to vector<1x4xf32>
    %34 = vector.broadcast %33 : vector<1x4xf32> to vector<8x4xf32>
    %35 = arith.addf %30, %34 : vector<8x4xf32>
    %c0_22 = arith.constant 0 : index
    %c0_23 = arith.constant 0 : index
    %36 = vector.load %arg5[%c0_22, %c0_23] : memref<8x4xf32, #tpu.memory_space<vmem>>, vector<8x4xf32>
    tpu.vector_store %arg5[%c0_22, %c0_23], %35 {strides = array<i32>} : memref<8x4xf32, #tpu.memory_space<vmem>>, vector<8x4xf32>,
    return
  }
  func.func @transform_0(%arg0: i32) -> (i32, i32) {
    %c0_i32 = arith.constant 0 : i32
    %c0_i32_0 = arith.constant 0 : i32
    return %arg0, %c0_i32 : i32, i32
  }
  func.func @transform_1(%arg0: i32) -> (i32, i32) {
    %c0_i32 = arith.constant 0 : i32
    %c0_i32_0 = arith.constant 0 : i32
    %c0_i32_1 = arith.constant 0 : i32
    return %c0_i32, %c0_i32_0 : i32, i32
  }
  func.func @transform_2(%arg0: i32) -> (i32, i32) {
    %c0_i32 = arith.constant 0 : i32
    %c0_i32_0 = arith.constant 0 : i32
    %c0_i32_1 = arith.constant 0 : i32
    return %c0_i32, %c0_i32_0 : i32, i32
  }
  func.func @transform_3(%arg0: i32) -> (i32, i32, i32) {
    %c0_i32 = arith.constant 0 : i32
    %c0_i32_0 = arith.constant 0 : i32
    %c0_i32_1 = arith.constant 0 : i32
    %c0_i32_2 = arith.constant 0 : i32
    return %c0_i32, %c0_i32_0, %c0_i32_1 : i32, i32, i32
  }
  func.func @transform_4(%arg0: i32) -> (i32, i32) {
    %c0_i32 = arith.constant 0 : i32
    %c0_i32_0 = arith.constant 0 : i32
    return %arg0, %c0_i32 : i32, i32
  }
}

</mosaic_0001>

<bundles_post_ra>
// kernel: robot_nn_forward.1
= control target key start
LH: loop header
LB: loop body
LE: loop exit
PB: predicated region body
PF: predicated region fallthrough
CT: control target
= control target key end

     0   :  { %vm582_vm0 = vcmask 654336   ;;  %vm1389_vm1 = vcmask 31744   ;;  %s2427_s1 = inlined_call_operand.vmem [shape: bf16[1280,256], index: 1, kind: input, shape index: {}]   ;;  %s2428_s0 = inlined_call_operand.vmem [shape: f32[8,720], index: 0, kind: input, shape index: {}]   ;;  %s2429_s3 = inlined_call_operand.vmem [shape: f32[4,1,256], index: 3, kind: input, shape index: {}]   ;;  %s2430_s2 = inlined_call_operand.vmem [shape: bf16[256,4], index: 2, kind: input, shape index: {}]   ;;  %s2431_s4 = inlined_call_operand.vmem [shape: f32[8,4], index: 4, kind: output, shape index: {}]  }
   0x1   :  { %v1601_v0 = vld [vmem:[%s2427_s1 + $0x4] ss:$8 sps:$4 sm:$0xff]   ;;  %v1603_v1 = vld [vmem:[%s2427_s1] ss:$8 sps:$4 sm:$0xff]   ;;  %v1604_v2 = vld [vmem:[%s2427_s1 + $0x14] ss:$8 sps:$4 sm:$0xff]  }
   0x2   :  { %586 = vmatprep.subr.bf16.mxu0 %v1601_v0  ;;  %v1606_v3 = vld [vmem:[%s2427_s1 + $0x10] ss:$8 sps:$4 sm:$0xff]   ;;  %v1607_v4 = vld [vmem:[%s2427_s1 + $0x24] ss:$8 sps:$4 sm:$0xff]   ;;  %v1609_v5 = vld [vmem:[%s2427_s1 + $0x20] ss:$8 sps:$4 sm:$0xff]  }
   0x3   :  { %587 = vmatpush1.bf16.msra.mxu0 %v1603_v1  ;;  %v1610_v6 = vld [vmem:[%s2427_s1 + $0x34] ss:$8 sps:$4 sm:$0xff]   ;;  %v1612_v7 = vld [vmem:[%s2427_s1 + $0x30] ss:$8 sps:$4 sm:$0xff]   ;;  %v1613_v8 = vld [vmem:[%s2427_s1 + $0x44] ss:$8 sps:$4 sm:$0xff]  }
   0x4   :  { %588 = vmatprep.subr.bf16.mxu0 %v1604_v2  ;;  %v1615_v9 = vld [vmem:[%s2427_s1 + $0x40] ss:$8 sps:$4 sm:$0xff]   ;;  %v1616_v10 = vld [vmem:[%s2427_s1 + $0x54] ss:$8 sps:$4 sm:$0xff]   ;;  %v1618_v11 = vld [vmem:[%s2427_s1 + $0x50] ss:$8 sps:$4 sm:$0xff]  }
   0x5   :  { %v1619_v12 = vld [vmem:[%s2427_s1 + $0x64] ss:$8 sps:$4 sm:$0xff]   ;;  %v1621_v15 = vld [vmem:[%s2427_s1 + $0x60] ss:$8 sps:$4 sm:$0xff]   ;;  %v1622_v16 = vld [vmem:[%s2427_s1 + $0x74] ss:$8 sps:$4 sm:$0xff]  }
   0x6   :  { %v19_v13 = vld [vmem:[%s2428_s0 + $0x8] sm:$0xff]  ;;  %v1624_v17 = vld [vmem:[%s2427_s1 + $0x70] ss:$8 sps:$4 sm:$0xff]   ;;  %v1628_v20 = vld [vmem:[%s2427_s1 + $0x94] ss:$8 sps:$4 sm:$0xff]  }
   0x7   :  { %589 = vmatpush1.bf16.msra.mxu0 %v1606_v3  ;;  %v25_v14 = vpack.c.bf16 %v19_v13, %v19_v13  ;;  %v1625_v18 = vld [vmem:[%s2427_s1 + $0x84] ss:$8 sps:$4 sm:$0xff]   ;;  %v1627_v19 = vld [vmem:[%s2427_s1 + $0x80] ss:$8 sps:$4 sm:$0xff]   ;;  %v1630_v21 = vld [vmem:[%s2427_s1 + $0x90] ss:$8 sps:$4 sm:$0xff]  }
   0x8   :  { %590 = vmatprep.subr.bf16.mxu0 %v1607_v4  ;;  %v1631_v22 = vld [vmem:[%s2427_s1 + $0xa4] ss:$8 sps:$4 sm:$0xff]   ;;  %v1633_v23 = vld [vmem:[%s2427_s1 + $0xa0] ss:$8 sps:$4 sm:$0xff]   ;;  %v1634_v24 = vld [vmem:[%s2427_s1 + $0xb4] ss:$8 sps:$4 sm:$0xff]  }
   0x9   :  { %618 = vmatprep.mubr.bf16.mxu0 %v25_v14  ;;  %v1636_v25 = vld [vmem:[%s2427_s1 + $0xb0] ss:$8 sps:$4 sm:$0xff]   ;;  %v1637_v26 = vld [vmem:[%s2427_s1 + $0xc4] ss:$8 sps:$4 sm:$0xff]   ;;  %v1639_v27 = vld [vmem:[%s2427_s1 + $0xc0] ss:$8 sps:$4 sm:$0xff]  }
   0xa   :  { %v1640_v28 = vld [vmem:[%s2427_s1 + $0xd4] ss:$8 sps:$4 sm:$0xff]   ;;  %v1642_v29 = vld [vmem:[%s2427_s1 + $0xd0] ss:$8 sps:$4 sm:$0xff]   ;;  %v1643_v30 = vld [vmem:[%s2427_s1 + $0xe4] ss:$8 sps:$4 sm:$0xff]  }
   0xb   :  { %591 = vmatpush1.bf16.msra.mxu0 %v1609_v5  ;;  %v1645_v31 = vld [vmem:[%s2427_s1 + $0xe0] ss:$8 sps:$4 sm:$0xff]   ;;  %v1646_v32 = vld [vmem:[%s2427_s1 + $0xf4] ss:$8 sps:$4 sm:$0xff]   ;;  %v1648_v33 = vld [vmem:[%s2427_s1 + $0xf0] ss:$8 sps:$4 sm:$0xff]  }
   0xc   :  { %592 = vmatprep.subr.bf16.mxu0 %v1610_v6  ;;  %v1651_v34 = vld [vmem:[%s2427_s1 + $0x104] ss:$8 sps:$4 sm:$0xff]   ;;  %v21_v36 = vld [vmem:[%s2428_s0 + $0x18] sm:$0xff]  ;;  %v1649_v37 = vld [vmem:[%s2427_s1 + $0x100] ss:$8 sps:$4 sm:$0xff]  }
   0xd   :  { %v18_v35 = vld [vmem:[%s2428_s0] sm:$0xff]  ;;  %v27_v40 = vpack.c.bf16 %v21_v36, %v21_v36  ;;  %v1654_v42 = vld [vmem:[%s2427_s1 + $0x114] ss:$8 sps:$4 sm:$0xff]   ;;  %v1741_v44 = vld [vmem:[%s2427_s1 + $0x310] ss:$8 sps:$4 sm:$0xff]  }
   0xe   :  { %v24_v38 = vpack.c.bf16 %v18_v35, %v18_v35  ;;  %v1736_v39 = vld [vmem:[%s2427_s1 + $0x304] ss:$8 sps:$4 sm:$0xff]   ;;  %v1738_v41 = vld [vmem:[%s2427_s1 + $0x300] ss:$8 sps:$4 sm:$0xff]   ;;  %v1739_v43 = vld [vmem:[%s2427_s1 + $0x314] ss:$8 sps:$4 sm:$0xff]  }
   0xf   :  { %593 = vmatpush1.bf16.msra.mxu0 %v1612_v7  ;;  %918 = vmatprep.subr.bf16.mxu1 %v1736_v39  ;;  %v1742_v45 = vld [vmem:[%s2427_s1 + $0x324] ss:$8 sps:$4 sm:$0xff]   ;;  %v1652_v46 = vld [vmem:[%s2427_s1 + $0x110] ss:$8 sps:$4 sm:$0xff]   ;;  %v1744_v48 = vld [vmem:[%s2427_s1 + $0x320] ss:$8 sps:$4 sm:$0xff]  }
  0x10   :  { %594 = vmatprep.subr.bf16.mxu0 %v1613_v8  ;;  %919 = vmatpush1.bf16.msra.mxu1 %v1738_v41  ;;  %v1657_v47 = vld [vmem:[%s2427_s1 + $0x124] ss:$8 sps:$4 sm:$0xff]   ;;  %v1745_v49 = vld [vmem:[%s2427_s1 + $0x334] ss:$8 sps:$4 sm:$0xff]   ;;  %v1655_v50 = vld [vmem:[%s2427_s1 + $0x120] ss:$8 sps:$4 sm:$0xff]  }
  0x11   :  { %920 = vmatprep.subr.bf16.mxu1 %v1739_v43  ;;  %v1660_v51 = vld [vmem:[%s2427_s1 + $0x134] ss:$8 sps:$4 sm:$0xff]   ;;  %v1747_v52 = vld [vmem:[%s2427_s1 + $0x330] ss:$8 sps:$4 sm:$0xff]   ;;  %v1748_v53 = vld [vmem:[%s2427_s1 + $0x344] ss:$8 sps:$4 sm:$0xff]  }
  0x12   :  { %v1658_v54 = vld [vmem:[%s2427_s1 + $0x130] ss:$8 sps:$4 sm:$0xff]   ;;  %v1663_v55 = vld [vmem:[%s2427_s1 + $0x144] ss:$8 sps:$4 sm:$0xff]   ;;  %v1750_v56 = vld [vmem:[%s2427_s1 + $0x340] ss:$8 sps:$4 sm:$0xff]  }
  0x13   :  { %595 = vmatpush1.bf16.msra.mxu0 %v1615_v9  ;;  %v1751_v57 = vld [vmem:[%s2427_s1 + $0x354] ss:$8 sps:$4 sm:$0xff]   ;;  %v1661_v58 = vld [vmem:[%s2427_s1 + $0x140] ss:$8 sps:$4 sm:$0xff]   ;;  %v1753_v60 = vld [vmem:[%s2427_s1 + $0x350] ss:$8 sps:$4 sm:$0xff]  }
  0x14   :  { %596 = vmatprep.subr.bf16.mxu0 %v1616_v10  ;;  %921 = vmatpush1.bf16.msra.mxu1 %v1741_v44  ;;  %v1666_v59 = vld [vmem:[%s2427_s1 + $0x154] ss:$8 sps:$4 sm:$0xff]   ;;  %v1754_v61 = vld [vmem:[%s2427_s1 + $0x364] ss:$8 sps:$4 sm:$0xff]   ;;  %v1664_v62 = vld [vmem:[%s2427_s1 + $0x150] ss:$8 sps:$4 sm:$0xff]  }
  0x15   :  { %922 = vmatprep.subr.bf16.mxu1 %v1742_v45  ;;  %v1669_v63 = vld [vmem:[%s2427_s1 + $0x164] ss:$8 sps:$4 sm:$0xff]   ;;  %v1756_v0 = vld [vmem:[%s2427_s1 + $0x360] ss:$8 sps:$4 sm:$0xff]   ;;  %v1757_v1 = vld [vmem:[%s2427_s1 + $0x374] ss:$8 sps:$4 sm:$0xff]  }
  0x16   :  { %v1667_v2 = vld [vmem:[%s2427_s1 + $0x160] ss:$8 sps:$4 sm:$0xff]   ;;  %v1672_v3 = vld [vmem:[%s2427_s1 + $0x174] ss:$8 sps:$4 sm:$0xff]   ;;  %v1759_v4 = vld [vmem:[%s2427_s1 + $0x370] ss:$8 sps:$4 sm:$0xff]  }
  0x17   :  { %597 = vmatpush1.bf16.msra.mxu0 %v1618_v11  ;;  %v1760_v5 = vld [vmem:[%s2427_s1 + $0x384] ss:$8 sps:$4 sm:$0xff]   ;;  %v1670_v6 = vld [vmem:[%s2427_s1 + $0x170] ss:$8 sps:$4 sm:$0xff]   ;;  %v1762_v8 = vld [vmem:[%s2427_s1 + $0x380] ss:$8 sps:$4 sm:$0xff]  }
  0x18   :  { %598 = vmatprep.subr.bf16.mxu0 %v1619_v12  ;;  %923 = vmatpush1.bf16.msra.mxu1 %v1744_v48  ;;  %v1675_v7 = vld [vmem:[%s2427_s1 + $0x184] ss:$8 sps:$4 sm:$0xff]   ;;  %v1763_v9 = vld [vmem:[%s2427_s1 + $0x394] ss:$8 sps:$4 sm:$0xff]   ;;  %v1673_v10 = vld [vmem:[%s2427_s1 + $0x180] ss:$8 sps:$4 sm:$0xff]  }
  0x19   :  { %924 = vmatprep.subr.bf16.mxu1 %v1745_v49  ;;  %v1678_v11 = vld [vmem:[%s2427_s1 + $0x194] ss:$8 sps:$4 sm:$0xff]   ;;  %v1765_v12 = vld [vmem:[%s2427_s1 + $0x390] ss:$8 sps:$4 sm:$0xff]   ;;  %v1766_v13 = vld [vmem:[%s2427_s1 + $0x3a4] ss:$8 sps:$4 sm:$0xff]  }
  0x1a   :  { %v1676_v14 = vld [vmem:[%s2427_s1 + $0x190] ss:$8 sps:$4 sm:$0xff]   ;;  %v1699_v35 = vld [vmem:[%s2427_s1 + $0x204] ss:$8 sps:$4 sm:$0xff]   ;;  %v1703_v43 = vld [vmem:[%s2427_s1 + $0x220] ss:$8 sps:$4 sm:$0xff]  }
  0x1b   :  { %599 = vmatpush1.bf16.msra.mxu0 %v1621_v15  ;;  %v1681_v15 = vld [vmem:[%s2427_s1 + $0x1a4] ss:$8 sps:$4 sm:$0xff]   ;;  %v1700_v41 = vld [vmem:[%s2427_s1 + $0x210] ss:$8 sps:$4 sm:$0xff]   ;;  %v1708_v44 = vld [vmem:[%s2427_s1 + $0x234] ss:$8 sps:$4 sm:$0xff]  }
  0x1c   :  { %600 = vmatprep.subr.bf16.mxu0 %v1622_v16  ;;  %925 = vmatpush1.bf16.msra.mxu1 %v1747_v52  ;;  %v1768_v16 = vld [vmem:[%s2427_s1 + $0x3a0] ss:$8 sps:$4 sm:$0xff]   ;;  %v1706_v45 = vld [vmem:[%s2427_s1 + $0x230] ss:$8 sps:$4 sm:$0xff]   ;;  %v1714_v48 = vld [vmem:[%s2427_s1 + $0x254] ss:$8 sps:$4 sm:$0xff]  }
  0x1d   :  { %926 = vmatprep.subr.bf16.mxu1 %v1748_v53  ;;  %v23_v36 = vld [vmem:[%s2428_s0 + $0x28] sm:$0xff]  ;;  %v1712_v49 = vld [vmem:[%s2427_s1 + $0x250] ss:$8 sps:$4 sm:$0xff]   ;;  %v1720_v52 = vld [vmem:[%s2427_s1 + $0x274] ss:$8 sps:$4 sm:$0xff]  }
  0x1e   :  { %v29_v39 = vpack.c.bf16 %v23_v36, %v23_v36  ;;  %v1718_v53 = vld [vmem:[%s2427_s1 + $0x270] ss:$8 sps:$4 sm:$0xff]   ;;  %v1802_v36 = vld [vmem:[%s2427_s1 + $0x460] ss:$8 sps:$4 sm:$0xff]  }
  0x1f   :  { %601 = vmatpush1.bf16.msra.mxu0 %v1624_v17  ;;  %v1769_v17 = vld [vmem:[%s2427_s1 + $0x3b4] ss:$8 sps:$4 sm:$0xff]  }
  0x20   :  { %602 = vmatprep.subr.bf16.mxu0 %v1625_v18  ;;  %927 = vmatpush1.bf16.msra.mxu1 %v1750_v56  ;;  %v1679_v18 = vld [vmem:[%s2427_s1 + $0x1a0] ss:$8 sps:$4 sm:$0xff]   ;;  %v1726_v56 = vld [vmem:[%s2427_s1 + $0x294] ss:$8 sps:$4 sm:$0xff]  }
  0x21   :  { %928 = vmatprep.subr.bf16.mxu1 %v1751_v57  ;;  %v1724_v57 = vld [vmem:[%s2427_s1 + $0x290] ss:$8 sps:$4 sm:$0xff]  }
  0x23   :  { %603 = vmatpush1.bf16.msra.mxu0 %v1627_v19  ;;  %v1684_v19 = vld [vmem:[%s2427_s1 + $0x1b4] ss:$8 sps:$4 sm:$0xff]  }
  0x24   :  { %604 = vmatprep.subr.bf16.mxu0 %v1628_v20  ;;  %929 = vmatpush1.bf16.msra.mxu1 %v1753_v60  ;;  %v1771_v20 = vld [vmem:[%s2427_s1 + $0x3b0] ss:$8 sps:$4 sm:$0xff]   ;;  %v1732_v60 = vld [vmem:[%s2427_s1 + $0x2b4] ss:$8 sps:$4 sm:$0xff]  }
  0x25   :  { %930 = vmatprep.subr.bf16.mxu1 %v1754_v61  ;;  %v1730_v61 = vld [vmem:[%s2427_s1 + $0x2b0] ss:$8 sps:$4 sm:$0xff]  }
  0x27   :  { %605 = vmatpush1.bf16.msra.mxu0 %v1630_v21  ;;  %v1772_v21 = vld [vmem:[%s2427_s1 + $0x3c4] ss:$8 sps:$4 sm:$0xff]  }
  0x28   :  { %606 = vmatprep.subr.bf16.mxu0 %v1631_v22  ;;  %931 = vmatpush1.bf16.msra.mxu1 %v1756_v0  ;;  %v1682_v22 = vld [vmem:[%s2427_s1 + $0x1b0] ss:$8 sps:$4 sm:$0xff]   ;;  %v22_v0 = vld [vmem:[%s2428_s0 + $0x20] sm:$0xff] }
  0x29   :  { %932 = vmatprep.subr.bf16.mxu1 %v1757_v1  ;;  %v28_v1 = vpack.c.bf16 %v22_v0, %v22_v0 }
  0x2b   :  { %607 = vmatpush1.bf16.msra.mxu0 %v1633_v23  ;;  %v1687_v23 = vld [vmem:[%s2427_s1 + $0x1c4] ss:$8 sps:$4 sm:$0xff]  }
  0x2c   :  { %608 = vmatprep.subr.bf16.mxu0 %v1634_v24  ;;  %933 = vmatpush1.bf16.msra.mxu1 %v1759_v4  ;;  %v1774_v24 = vld [vmem:[%s2427_s1 + $0x3c0] ss:$8 sps:$4 sm:$0xff]   ;;  %v1781_v4 = vld [vmem:[%s2427_s1 + $0x3f4] ss:$8 sps:$4 sm:$0xff]  }
  0x2d   :  { %934 = vmatprep.subr.bf16.mxu1 %v1760_v5  ;;  %v1783_v5 = vld [vmem:[%s2427_s1 + $0x3f0] ss:$8 sps:$4 sm:$0xff]  }
  0x2f   :  { %609 = vmatpush1.bf16.msra.mxu0 %v1636_v25  ;;  %v1775_v25 = vld [vmem:[%s2427_s1 + $0x3d4] ss:$8 sps:$4 sm:$0xff]  }
  0x30   :  { %610 = vmatprep.subr.bf16.mxu0 %v1637_v26  ;;  %935 = vmatpush1.bf16.msra.mxu1 %v1762_v8  ;;  %v1685_v26 = vld [vmem:[%s2427_s1 + $0x1c0] ss:$8 sps:$4 sm:$0xff]  }
  0x31   :  { %936 = vmatprep.subr.bf16.mxu1 %v1763_v9 }
  0x33   :  { %611 = vmatpush1.bf16.msra.mxu0 %v1639_v27  ;;  %v1690_v27 = vld [vmem:[%s2427_s1 + $0x1d4] ss:$8 sps:$4 sm:$0xff]  }
  0x34   :  { %612 = vmatprep.subr.bf16.mxu0 %v1640_v28  ;;  %937 = vmatpush1.bf16.msra.mxu1 %v1765_v12  ;;  %v1777_v28 = vld [vmem:[%s2427_s1 + $0x3d0] ss:$8 sps:$4 sm:$0xff]  }
  0x35   :  { %938 = vmatprep.subr.bf16.mxu1 %v1766_v13 }
  0x37   :  { %613 = vmatpush1.bf16.msra.mxu0 %v1642_v29  ;;  %v1688_v29 = vld [vmem:[%s2427_s1 + $0x1d0] ss:$8 sps:$4 sm:$0xff]  }
  0x38   :  { %614 = vmatprep.subr.bf16.mxu0 %v1643_v30  ;;  %939 = vmatpush1.bf16.msra.mxu1 %v1768_v16  ;;  %v1693_v30 = vld [vmem:[%s2427_s1 + $0x1e4] ss:$8 sps:$4 sm:$0xff]  }
  0x39   :  { %940 = vmatprep.subr.bf16.mxu1 %v1769_v17 }
  0x3b   :  { %615 = vmatpush1.bf16.msra.mxu0 %v1645_v31  ;;  %v1691_v31 = vld [vmem:[%s2427_s1 + $0x1e0] ss:$8 sps:$4 sm:$0xff]  }
  0x3c   :  { %616 = vmatprep.subr.bf16.mxu0 %v1646_v32  ;;  %941 = vmatpush1.bf16.msra.mxu1 %v1771_v20  ;;  %v1696_v32 = vld [vmem:[%s2427_s1 + $0x1f4] ss:$8 sps:$4 sm:$0xff]  }
  0x3d   :  { %942 = vmatprep.subr.bf16.mxu1 %v1772_v21 }
  0x3f   :  { %617 = vmatpush1.bf16.msra.mxu0 %v1648_v33  ;;  %v1694_v33 = vld [vmem:[%s2427_s1 + $0x1f0] ss:$8 sps:$4 sm:$0xff]  }
  0x40   :  { %627 = vmatprep.subr.bf16.mxu0 %v1651_v34  ;;  %943 = vmatpush1.bf16.msra.mxu1 %v1774_v24  ;;  %v20_v34 = vld [vmem:[%s2428_s0 + $0x10] sm:$0xff] }
  0x41   :  { %944 = vmatprep.subr.bf16.mxu1 %v1775_v25  ;;  %v1789_v25 = vld [vmem:[%s2427_s1 + $0x414] ss:$8 sps:$4 sm:$0xff]  }
  0x42   :  { %619 = vmatmul.mubr.bf16.vlgmr.msra.gmra.mrb[0].mxu0 %v24_v38  ;;  %v1697_v38 = vld [vmem:[%s2427_s1 + $0x200] ss:$8 sps:$4 sm:$0xff]  }
  0x43   :  { %628 = vmatpush1.bf16.msra.mxu0 %v1649_v37  ;;  %659 = vmatprep.mubr.bf16.mxu0 %v27_v40  ;;  %v26_v37 = vpack.c.bf16 %v20_v34, %v20_v34  ;;  %v1702_v40 = vld [vmem:[%s2427_s1 + $0x214] ss:$8 sps:$4 sm:$0xff]   ;;  %v1799_v34 = vld [vmem:[%s2427_s1 + $0x450] ss:$8 sps:$4 sm:$0xff]  }
  0x44   :  { %629 = vmatprep.subr.bf16.mxu0 %v1654_v42  ;;  %945 = vmatpush1.bf16.msra.mxu1 %v1777_v28  ;;  %v1705_v42 = vld [vmem:[%s2427_s1 + $0x224] ss:$8 sps:$4 sm:$0xff]   ;;  %v1790_v28 = vld [vmem:[%s2427_s1 + $0x420] ss:$8 sps:$4 sm:$0xff]  }
  0x47   :  { %630 = vmatpush1.bf16.msra.mxu0 %v1652_v46  ;;  %v1711_v46 = vld [vmem:[%s2427_s1 + $0x244] ss:$8 sps:$4 sm:$0xff]  }
  0x48   :  { %631 = vmatprep.subr.bf16.mxu0 %v1657_v47  ;;  %v1709_v47 = vld [vmem:[%s2427_s1 + $0x240] ss:$8 sps:$4 sm:$0xff]  }
  0x4b   :  { %632 = vmatpush1.bf16.msra.mxu0 %v1655_v50  ;;  %v1717_v50 = vld [vmem:[%s2427_s1 + $0x264] ss:$8 sps:$4 sm:$0xff]  }
  0x4c   :  { %633 = vmatprep.subr.bf16.mxu0 %v1660_v51  ;;  %v1715_v51 = vld [vmem:[%s2427_s1 + $0x260] ss:$8 sps:$4 sm:$0xff]  }
  0x4f   :  { %634 = vmatpush1.bf16.msra.mxu0 %v1658_v54  ;;  %v1723_v54 = vld [vmem:[%s2427_s1 + $0x284] ss:$8 sps:$4 sm:$0xff]  }
  0x50   :  { %635 = vmatprep.subr.bf16.mxu0 %v1663_v55  ;;  %v1721_v55 = vld [vmem:[%s2427_s1 + $0x280] ss:$8 sps:$4 sm:$0xff]  }
  0x53   :  { %636 = vmatpush1.bf16.msra.mxu0 %v1661_v58  ;;  %v1729_v58 = vld [vmem:[%s2427_s1 + $0x2a4] ss:$8 sps:$4 sm:$0xff]  }
  0x54   :  { %637 = vmatprep.subr.bf16.mxu0 %v1666_v59  ;;  %v1727_v59 = vld [vmem:[%s2427_s1 + $0x2a0] ss:$8 sps:$4 sm:$0xff]  }
  0x57   :  { %638 = vmatpush1.bf16.msra.mxu0 %v1664_v62  ;;  %v1735_v62 = vld [vmem:[%s2427_s1 + $0x2c4] ss:$8 sps:$4 sm:$0xff]  }
  0x58   :  { %639 = vmatprep.subr.bf16.mxu0 %v1669_v63  ;;  %v1733_v63 = vld [vmem:[%s2427_s1 + $0x2c0] ss:$8 sps:$4 sm:$0xff]  }
  0x5b   :  { %640 = vmatpush1.bf16.msra.mxu0 %v1667_v2  ;;  %v1778_v2 = vld [vmem:[%s2427_s1 + $0x3e4] ss:$8 sps:$4 sm:$0xff]  }
  0x5c   :  { %641 = vmatprep.subr.bf16.mxu0 %v1672_v3  ;;  %v1780_v3 = vld [vmem:[%s2427_s1 + $0x3e0] ss:$8 sps:$4 sm:$0xff]   ;;  %946 = vmatprep.subr.bf16.mxu1 %v1778_v2 }
  0x5d   :  { %947 = vmatpush1.bf16.msra.mxu1 %v1780_v3 }
  0x5e   :  { %948 = vmatprep.subr.bf16.mxu1 %v1781_v4  ;;  %v1833_v4 = vld [vmem:[%s2430_s2] sm:$0xff]  }
  0x5f   :  { %642 = vmatpush1.bf16.msra.mxu0 %v1670_v6  ;;  %v1786_v6 = vld [vmem:[%s2427_s1 + $0x404] ss:$8 sps:$4 sm:$0xff]  }
  0x60   :  { %643 = vmatprep.subr.bf16.mxu0 %v1675_v7  ;;  %v122_v7 = vlaneseq }
  0x61   :  { %949 = vmatpush1.bf16.msra.mxu1 %v1783_v5 }
  0x62   :  { %1168 = vmatprep.subr.bf16.mxu1 %v1786_v6  ;;  %v123_v8 = vshrl.u32 %v122_v7, 7  ;;  %v1834_v6 = vld [vmem:[%s2430_s2 + $0x48] sm:$0xff]  }
  0x63   :  { %644 = vmatpush1.bf16.msra.mxu0 %v1673_v10  ;;  %v120_v10 = vld [vmem:[%s2429_s3] sm:$0x3]  ;;  %v1835_v7 = vld [vmem:[%s2430_s2 + $0x8] sm:$0xff]  }
  0x64   :  { %645 = vmatprep.subr.bf16.mxu0 %v1678_v11  ;;  %v2260_v9 = vsub.s32 0, %v123_v8  ;;  %v2265_v11 = vsub.s32 1, %v123_v8  ;;  %v1836_v8 = vld [vmem:[%s2430_s2 + $0x50] sm:$0xff]  }
  0x66   :  { %v125_v12 = vrot.slane %v120_v10, %v2260_v9  ;;  %v129_v13 = vrot.slane %v120_v10, %v2265_v11  ;;  %v1837_v10 = vld [vmem:[%s2430_s2 + $0x10] sm:$0xff]  }
  0x67   :  { %646 = vmatpush1.bf16.msra.mxu0 %v1676_v14 }
  0x68   :  { %647 = vmatprep.subr.bf16.mxu0 %v1681_v15 }
  0x6b   :  { %648 = vmatpush1.bf16.msra.mxu0 %v1679_v18 }
  0x6c   :  { %649 = vmatprep.subr.bf16.mxu0 %v1684_v19 }
  0x6f   :  { %650 = vmatpush1.bf16.msra.mxu0 %v1682_v22 }
  0x70   :  { %651 = vmatprep.subr.bf16.mxu0 %v1687_v23  ;;  %v1784_v23 = vld [vmem:[%s2427_s1 + $0x400] ss:$8 sps:$4 sm:$0xff]  }
  0x73   :  { %652 = vmatpush1.bf16.msra.mxu0 %v1685_v26  ;;  %v1787_v26 = vld [vmem:[%s2427_s1 + $0x410] ss:$8 sps:$4 sm:$0xff]  }
  0x74   :  { %653 = vmatprep.subr.bf16.mxu0 %v1690_v27  ;;  %v1792_v27 = vld [vmem:[%s2427_s1 + $0x424] ss:$8 sps:$4 sm:$0xff]  }
  0x77   :  { %654 = vmatpush1.bf16.msra.mxu0 %v1688_v29  ;;  %v1795_v29 = vld [vmem:[%s2427_s1 + $0x434] ss:$8 sps:$4 sm:$0xff]  }
  0x78   :  { %655 = vmatprep.subr.bf16.mxu0 %v1693_v30  ;;  %v1793_v30 = vld [vmem:[%s2427_s1 + $0x430] ss:$8 sps:$4 sm:$0xff]  }
  0x7b   :  { %656 = vmatpush1.bf16.msra.mxu0 %v1691_v31  ;;  %v1798_v31 = vld [vmem:[%s2427_s1 + $0x444] ss:$8 sps:$4 sm:$0xff]  }
  0x7c   :  { %657 = vmatprep.subr.bf16.mxu0 %v1696_v32  ;;  %v1796_v32 = vld [vmem:[%s2427_s1 + $0x440] ss:$8 sps:$4 sm:$0xff]  }
  0x7f   :  { %658 = vmatpush1.bf16.msra.mxu0 %v1694_v33  ;;  %v1801_v33 = vld [vmem:[%s2427_s1 + $0x454] ss:$8 sps:$4 sm:$0xff]  }
  0x80   :  { %668 = vmatprep.subr.bf16.mxu0 %v1699_v35  ;;  %v1804_v35 = vld [vmem:[%s2427_s1 + $0x464] ss:$8 sps:$4 sm:$0xff]  }
  0x82   :  { %660 = vmatmul.mubr.bf16.vlgmr.msra.gmra.mrb[0].mxu0 %v26_v37  ;;  %v1807_v37 = vld [vmem:[%s2427_s1 + $0x474] ss:$8 sps:$4 sm:$0xff]  }
  0x83   :  { %669 = vmatpush1.bf16.msra.mxu0 %v1697_v38  ;;  %1485 = vmatprep.mubr.msk.bf16.mxu0 %vm582_vm0, %v29_v39  ;;  %v1805_v38 = vld [vmem:[%s2427_s1 + $0x470] ss:$8 sps:$4 sm:$0xff]   ;;  %v1810_v39 = vld [vmem:[%s2427_s1 + $0x484] ss:$8 sps:$4 sm:$0xff]  }
  0x84   :  { %670 = vmatprep.subr.bf16.mxu0 %v1702_v40  ;;  %v1808_v40 = vld [vmem:[%s2427_s1 + $0x480] ss:$8 sps:$4 sm:$0xff]  }
  0x87   :  { %671 = vmatpush1.bf16.msra.mxu0 %v1700_v41  ;;  %v1813_v41 = vld [vmem:[%s2427_s1 + $0x494] ss:$8 sps:$4 sm:$0xff]  }
  0x88   :  { %672 = vmatprep.subr.bf16.mxu0 %v1705_v42  ;;  %v1811_v42 = vld [vmem:[%s2427_s1 + $0x490] ss:$8 sps:$4 sm:$0xff]  }
  0x8b   :  { %673 = vmatpush1.bf16.msra.mxu0 %v1703_v43  ;;  %v1816_v43 = vld [vmem:[%s2427_s1 + $0x4a4] ss:$8 sps:$4 sm:$0xff]  }
  0x8c   :  { %674 = vmatprep.subr.bf16.mxu0 %v1708_v44  ;;  %v1814_v44 = vld [vmem:[%s2427_s1 + $0x4a0] ss:$8 sps:$4 sm:$0xff]  }
  0x8f   :  { %675 = vmatpush1.bf16.msra.mxu0 %v1706_v45  ;;  %v1819_v45 = vld [vmem:[%s2427_s1 + $0x4b4] ss:$8 sps:$4 sm:$0xff]  }
  0x90   :  { %676 = vmatprep.subr.bf16.mxu0 %v1711_v46  ;;  %v1817_v46 = vld [vmem:[%s2427_s1 + $0x4b0] ss:$8 sps:$4 sm:$0xff]  }
  0x93   :  { %677 = vmatpush1.bf16.msra.mxu0 %v1709_v47  ;;  %v1822_v47 = vld [vmem:[%s2427_s1 + $0x4c4] ss:$8 sps:$4 sm:$0xff]  }
  0x94   :  { %678 = vmatprep.subr.bf16.mxu0 %v1714_v48  ;;  %v1820_v48 = vld [vmem:[%s2427_s1 + $0x4c0] ss:$8 sps:$4 sm:$0xff]  }
  0x97   :  { %679 = vmatpush1.bf16.msra.mxu0 %v1712_v49  ;;  %v1825_v49 = vld [vmem:[%s2427_s1 + $0x4d4] ss:$8 sps:$4 sm:$0xff]  }
  0x98   :  { %680 = vmatprep.subr.bf16.mxu0 %v1717_v50  ;;  %v1823_v50 = vld [vmem:[%s2427_s1 + $0x4d0] ss:$8 sps:$4 sm:$0xff]  }
  0x9b   :  { %681 = vmatpush1.bf16.msra.mxu0 %v1715_v51  ;;  %v1828_v51 = vld [vmem:[%s2427_s1 + $0x4e4] ss:$8 sps:$4 sm:$0xff]  }
  0x9c   :  { %682 = vmatprep.subr.bf16.mxu0 %v1720_v52  ;;  %v1826_v52 = vld [vmem:[%s2427_s1 + $0x4e0] ss:$8 sps:$4 sm:$0xff]  }
  0x9f   :  { %683 = vmatpush1.bf16.msra.mxu0 %v1718_v53  ;;  %v1831_v53 = vld [vmem:[%s2427_s1 + $0x4f4] ss:$8 sps:$4 sm:$0xff]  }
  0xa0   :  { %684 = vmatprep.subr.bf16.mxu0 %v1723_v54  ;;  %v1829_v54 = vld [vmem:[%s2427_s1 + $0x4f0] ss:$8 sps:$4 sm:$0xff]  }
  0xa3   :  { %685 = vmatpush1.bf16.msra.mxu0 %v1721_v55  ;;  %v1832_v55 = vld [vmem:[%s2430_s2 + $0x40] sm:$0xff]  }
  0xa4   :  { %686 = vmatprep.subr.bf16.mxu0 %v1726_v56  ;;  %v1486_v56 = vld [vmem:[%s2429_s3 + $0x2] sm:$0x3] }
  0xa7   :  { %687 = vmatpush1.bf16.msra.mxu0 %v1724_v57  ;;  %v751_v57 = vrot.slane %v1486_v56, %v2260_v9 }
  0xa8   :  { %688 = vmatprep.subr.bf16.mxu0 %v1729_v58  ;;  %v755_v58 = vrot.slane %v1486_v56, %v2265_v11 }
  0xab   :  { %689 = vmatpush1.bf16.msra.mxu0 %v1727_v59 }
  0xac   :  { %690 = vmatprep.subr.bf16.mxu0 %v1732_v60 }
  0xaf   :  { %691 = vmatpush1.bf16.msra.mxu0 %v1730_v61 }
  0xb0   :  { %692 = vmatprep.subr.bf16.mxu0 %v1735_v62 }
  0xb3   :  { %693 = vmatpush1.bf16.msra.mxu0 %v1733_v63 }
  0xb6   :  { %701 = vmatmul.mubr.bf16.vlgmr.msra.gmra.mrb[0].mxu0 %v28_v1 }
 0x189   :  { %v702_v14 = vpop.f32.mrb[0].mxu0 }
 0x18a   :  { %v1591_v15 = vadd.f32 %v702_v14, %v125_v12  ;;  %v704_v16 = vpop.f32.mrb[1].mxu0  ;;  %v1838_v12 = vld [vmem:[%s2430_s2 + $0x58] sm:$0xff]   ;;  %v1840_v14 = vld [vmem:[%s2430_s2 + $0x60] sm:$0xff]  }
 0x18b   :  { %v1592_v17 = vadd.f32 %v704_v16, %v129_v13  ;;  %v706_v18 = vpop.f32.mrb[2].mxu0  ;;  %v1839_v13 = vld [vmem:[%s2430_s2 + $0x18] sm:$0xff]   ;;  %v1842_v16 = vld [vmem:[%s2430_s2 + $0x68] sm:$0xff]  }
 0x18c   :  { %v709_v19 = vmax.f32 %v1591_v15, 0.0  ;;  %v707_v20 = vpop.f32.mrb[3].mxu0  ;;  %v1841_v15 = vld [vmem:[%s2430_s2 + $0x20] sm:$0xff]   ;;  %v1844_v18 = vld [vmem:[%s2430_s2 + $0x70] sm:$0xff]  }
 0x18d   :  { %v710_v21 = vmax.f32 %v1592_v17, 0.0  ;;  %v1843_v17 = vld [vmem:[%s2430_s2 + $0x28] sm:$0xff]   ;;  %v1846_v20 = vld [vmem:[%s2430_s2 + $0x78] sm:$0xff]  }
 0x18e   :  { %v743_v24 = vpack.c.bf16 %v709_v19, %v709_v19  ;;  %v1845_v19 = vld [vmem:[%s2430_s2 + $0x30] sm:$0xff]  }
 0x18f   :  { %v744_v22 = vpack.c.bf16 %v710_v21, %v710_v21  ;;  %v1847_v21 = vld [vmem:[%s2430_s2 + $0x38] sm:$0xff]  }
 0x191   :  { %950 = vmatprep.mubr.bf16.mxu1 %v744_v22  ;;  %v1519_v22 = vld [vmem:[%s2429_s3 + $0x4] sm:$0x3] }
 0x192   :  { %951 = vmatmul.mubr.bf16.vlgmr.msra.gmra.mrb[0].mxu1 %v743_v24  ;;  %v1005_v24 = vrot.slane %v1519_v22, %v2265_v11 }
 0x193   :  { %1169 = vmatpush1.bf16.msra.mxu1 %v1784_v23  ;;  %v1001_v23 = vrot.slane %v1519_v22, %v2260_v9 }
 0x194   :  { %1170 = vmatprep.subr.bf16.mxu1 %v1789_v25 }
 0x197   :  { %1171 = vmatpush1.bf16.msra.mxu1 %v1787_v26 }
 0x198   :  { %1172 = vmatprep.subr.bf16.mxu1 %v1792_v27 }
 0x19b   :  { %1173 = vmatpush1.bf16.msra.mxu1 %v1790_v28 }
 0x19c   :  { %1174 = vmatprep.subr.bf16.mxu1 %v1795_v29 }
 0x19f   :  { %1175 = vmatpush1.bf16.msra.mxu1 %v1793_v30 }
 0x1a0   :  { %1176 = vmatprep.subr.bf16.mxu1 %v1798_v31 }
 0x1a3   :  { %1177 = vmatpush1.bf16.msra.mxu1 %v1796_v32 }
 0x1a4   :  { %1178 = vmatprep.subr.bf16.mxu1 %v1801_v33 }
 0x1a7   :  { %1179 = vmatpush1.bf16.msra.mxu1 %v1799_v34 }
 0x1a8   :  { %1180 = vmatprep.subr.bf16.mxu1 %v1804_v35  ;;  %v1552_v35 = vld [vmem:[%s2429_s3 + $0x6] sm:$0x3] }
 0x1ab   :  { %1181 = vmatpush1.bf16.msra.mxu1 %v1802_v36 }
 0x1ac   :  { %1182 = vmatprep.subr.bf16.mxu1 %v1807_v37  ;;  %v1251_v37 = vrot.slane %v1552_v35, %v2260_v9 }
 0x1af   :  { %1183 = vmatpush1.bf16.msra.mxu1 %v1805_v38 }
 0x1b0   :  { %1184 = vmatprep.subr.bf16.mxu1 %v1810_v39 }
 0x1b3   :  { %1185 = vmatpush1.bf16.msra.mxu1 %v1808_v40 }
 0x1b4   :  { %1186 = vmatprep.subr.bf16.mxu1 %v1813_v41 }
 0x1b7   :  { %1187 = vmatpush1.bf16.msra.mxu1 %v1811_v42 }
 0x1b8   :  { %1188 = vmatprep.subr.bf16.mxu1 %v1816_v43 }
 0x1bb   :  { %1189 = vmatpush1.bf16.msra.mxu1 %v1814_v44 }
 0x1bc   :  { %1190 = vmatprep.subr.bf16.mxu1 %v1819_v45 }
 0x1bf   :  { %1191 = vmatpush1.bf16.msra.mxu1 %v1817_v46 }
 0x1c0   :  { %1192 = vmatprep.subr.bf16.mxu1 %v1822_v47 }
 0x1c3   :  { %1193 = vmatpush1.bf16.msra.mxu1 %v1820_v48 }
 0x1c4   :  { %1194 = vmatprep.subr.bf16.mxu1 %v1825_v49 }
 0x1c7   :  { %1195 = vmatpush1.bf16.msra.mxu1 %v1823_v50 }
 0x1c8   :  { %1196 = vmatprep.subr.bf16.mxu1 %v1828_v51 }
 0x1cb   :  { %1197 = vmatpush1.bf16.msra.mxu1 %v1826_v52 }
 0x1cc   :  { %1198 = vmatprep.subr.bf16.mxu1 %v1831_v53 }
 0x1cf   :  { %1199 = vmatpush1.bf16.msra.mxu1 %v1829_v54 }
 0x1d0   :  { %1569 = vmatprep.subr.bf16.mxu1 %v1832_v55 }
 0x265   :  { %v952_v59 = vpop.f32.mrb[0].mxu1 }
 0x266   :  { %v953_v60 = vadd.f32 %v952_v59, %v751_v57  ;;  %v954_v61 = vpop.f32.mrb[1].mxu1 }
 0x267   :  { %v955_v62 = vadd.f32 %v954_v61, %v755_v58  ;;  %v956_v63 = vpop.f32.mrb[2].mxu1 }
 0x268   :  { %v959_v0 = vmax.f32 %v953_v60, 0.0  ;;  %v957_v1 = vpop.f32.mrb[3].mxu1 }
 0x269   :  { %v960_v2 = vmax.f32 %v955_v62, 0.0 }
 0x26a   :  { %v993_v5 = vpack.c.bf16 %v959_v0, %v959_v0 }
 0x26b   :  { %v994_v3 = vpack.c.bf16 %v960_v2, %v960_v2 }
 0x26d   :  { %1200 = vmatprep.mubr.bf16.mxu1 %v994_v3 }
 0x26e   :  { %1201 = vmatmul.mubr.bf16.vlgmr.msra.gmra.mrb[4].mxu1 %v993_v5 }
 0x26f   :  { %1570 = vmatpush3.bf16.msra.mxu1 %v1833_v4 }
 0x270   :  { %1571 = vmatprep.subr.bf16.mxu1 %v1834_v6 }
 0x273   :  { %1572 = vmatpush3.bf16.msra.mxu1 %v1835_v7 }
 0x274   :  { %1573 = vmatprep.subr.bf16.mxu1 %v1836_v8 }
 0x277   :  { %1574 = vmatpush3.bf16.msra.mxu1 %v1837_v10 }
 0x278   :  { %1575 = vmatprep.subr.bf16.mxu1 %v1838_v12 }
 0x27b   :  { %1576 = vmatpush3.bf16.msra.mxu1 %v1839_v13 }
 0x27c   :  { %1577 = vmatprep.subr.bf16.mxu1 %v1840_v14 }
 0x27f   :  { %1578 = vmatpush3.bf16.msra.mxu1 %v1841_v15 }
 0x280   :  { %1579 = vmatprep.subr.bf16.mxu1 %v1842_v16 }
 0x283   :  { %1580 = vmatpush3.bf16.msra.mxu1 %v1843_v17 }
 0x284   :  { %1581 = vmatprep.subr.bf16.mxu1 %v1844_v18 }
 0x287   :  { %1582 = vmatpush3.bf16.msra.mxu1 %v1845_v19 }
 0x288   :  { %1583 = vmatprep.subr.bf16.mxu1 %v1846_v20 }
 0x28b   :  { %1584 = vmatpush3.bf16.msra.mxu1 %v1847_v21 }
 0x341   :  { %v1202_v25 = vpop.f32.mrb[4].mxu1 }
 0x342   :  { %v1203_v26 = vadd.f32 %v1202_v25, %v1001_v23  ;;  %v1204_v27 = vpop.f32.mrb[5].mxu1 }
 0x343   :  { %v1205_v28 = vadd.f32 %v1204_v27, %v1005_v24  ;;  %v1206_v29 = vpop.f32.mrb[6].mxu1 }
 0x344   :  { %v1209_v30 = vmax.f32 %v1203_v26, 0.0  ;;  %v1207_v31 = vpop.f32.mrb[7].mxu1 }
 0x345   :  { %v1210_v32 = vmax.f32 %v1205_v28, 0.0 }
 0x346   :  { %v1211_v34 = vpack.c.bf16 %v1209_v30, %v1209_v30 }
 0x347   :  { %v1212_v33 = vpack.c.bf16 %v1210_v32, %v1210_v32 }
 0x349   :  { %1381 = vmatprep.mubr.bf16.mxu1 %v1212_v33 }
 0x34a   :  { %1382 = vmatmul.mubr.bf16.vlgmr.msra.gmra.mrb[8].mxu1 %v1211_v34 }
 0x41d   :  { %v1585_v36 = vpop.f32.mrb[8].mxu1 }
 0x41e   :  { %v1586_v11 = vpop.f32.mrb[9].mxu1 }
 0x41f   :  { %v1587_v38 = vadd.f32 %v1586_v11, %v1585_v36  ;;  %v1588_v39 = vpop.f32.mrb[10].mxu1 }
 0x420   :  { %v1589_v40 = vpop.f32.mrb[11].mxu1 }
 0x421   :  { %v1384_v41 = vadd.f32 %v1587_v38, %v1251_v37 }
 0x423   :  { %1390 = vst.msk [vmem:[%s2431_s4] sm:$0xff] %vm1389_vm1, %v1384_v41 }

</bundles_post_ra>
